<compile_context>
chip_gen: v5e
topology: v5e:2x2
jax: 0.10.0
libtpu: 0.0.40
codegen_flags: <defaults>
</compile_context>

<pallas_src>
import functools

import jax
import jax.numpy as jnp
from jax.experimental import pallas as pl
from jax.experimental.pallas import tpu as pltpu

HIDDEN_DIM = 128
OUT_PAD = 128        # lane-dense padded output width
MAX_BLOCK_B = 512    # per-review sweep: big blocks amortize ~0.35us/step overhead


def _round_up(x, m):
    return ((x + m - 1) // m) * m


def _pick_act_dtype():
    """bf16 elementwise epilogue only on generations with bf16 VPU/EUP (v6e+)."""
    try:
        kind = jax.devices()[0].device_kind.lower()
    except Exception:  # pragma: no cover - no backend available
        return jnp.float32
    if any(tag in kind for tag in ("v2", "v3", "v4", "v5")):
        return jnp.float32
    return jnp.bfloat16


_ACT_DTYPE = _pick_act_dtype()


def sampler_kernel(x_ref, w1_ref, b_ref, w2_ref, out_ref, *, act_dtype):
    # ---- Layer 1: fused (state||noise) @ [ws; wn] + (bs + bn), tanh. ----
    # Kept fully f32: K = state_dim + noise_dim is tiny, accuracy is free.
    h = jnp.dot(x_ref[...], w1_ref[...], preferred_element_type=jnp.float32)
    h = jnp.tanh((h + b_ref[0:1, :]).astype(act_dtype))

    # ---- Hidden layer (128x128, bf16 MXU operands, f32 accumulation). ----
    h = jnp.dot(h.astype(jnp.bfloat16), w2_ref[0],
                preferred_element_type=jnp.float32)
    h = jnp.tanh((h + b_ref[1:2, :]).astype(act_dtype))

    # ---- Output layer (zero-padded to 128 lanes), tanh, bf16 writeback. ----
    o = jnp.dot(h.astype(jnp.bfloat16), w2_ref[1],
                preferred_element_type=jnp.float32)
    o = jnp.tanh(o + b_ref[2:3, :])
    out_ref[...] = o.astype(out_ref.dtype)


@functools.partial(jax.jit, static_argnames=("action_dim",))
def sampler_forward(state, noise, params, action_dim):
    """state: (B, state_dim), noise: (B, noise_dim) -> (B, action_dim) float32."""
    B = state.shape[0]
    x = jnp.concatenate([state, noise], axis=1).astype(jnp.float32)
    in_dim = x.shape[1]

    # Batch tiling: one block for small/medium B; >=2 blocks (capped at 512 rows)
    # for large B so the "parallel" grid axis can shard across v7x's two TCs.
    if B <= MAX_BLOCK_B:
        block_b = _round_up(B, 8)
    else:
        block_b = min(MAX_BLOCK_B, _round_up(pl.cdiv(B, 2), 8))
    b_pad = pl.cdiv(B, block_b) * block_b
    if b_pad != B:
        x = jnp.pad(x, ((0, b_pad - B), (0, 0)))

    w1 = params["w1"]   # (in_dim, 128)   f32
    b = params["b"]     # (3, 128)        f32   rows: layer1, hidden, output(padded)
    w2 = params["w2"]   # (2, 128, 128)   bf16  [hidden, output(padded)]

    kernel = functools.partial(sampler_kernel, act_dtype=_ACT_DTYPE)

    out = pl.pallas_call(
        kernel,
        out_shape=jax.ShapeDtypeStruct((b_pad, OUT_PAD), jnp.bfloat16),
        grid=(b_pad // block_b,),
        in_specs=[
            pl.BlockSpec((block_b, in_dim), lambda i: (i, 0)),
            # Weights / biases: full blocks, constant index_map -> VMEM-resident.
            pl.BlockSpec(w1.shape, lambda i: (0, 0)),
            pl.BlockSpec(b.shape, lambda i: (0, 0)),
            pl.BlockSpec(w2.shape, lambda i: (0, 0, 0)),
        ],
        out_specs=pl.BlockSpec((block_b, OUT_PAD), lambda i: (i, 0)),
        compiler_params=pltpu.CompilerParams(dimension_semantics=("parallel",)),
    )(x, w1, b, w2)

    return out[:B, :action_dim].astype(jnp.float32)


def init_params(key, state_dim, noise_dim, hidden_dim, output_dim):
    """Deterministic init mimicking nn.Linear default (uniform +-1/sqrt(fan_in)).

    Returns:
      raw:   per-layer f32 params matching the PyTorch module structure
             (weights as (in, out), biases as (1, out)) — used by the reference.
      fused: kernel params:
             w1 = [ws; wn] stacked (f32),
             b  = stack(bs + bn, bh, bo_padded) as one (3, 128) f32 slab,
             w2 = stack(wh, wo_padded) as one (2, 128, 128) bf16 slab.
    """
    def linear(k, fan_in, fan_out):
        kw, kb = jax.random.split(k)
        bound = 1.0 / jnp.sqrt(jnp.float32(fan_in))
        w = jax.random.uniform(kw, (fan_in, fan_out), jnp.float32, -bound, bound)
        b = jax.random.uniform(kb, (1, fan_out), jnp.float32, -bound, bound)
        return w, b

    k1, k2, k3, k4 = jax.random.split(key, 4)
    ws, bs = linear(k1, state_dim, hidden_dim)
    wn, bn = linear(k2, noise_dim, hidden_dim)
    wh, bh = linear(k3, hidden_dim, hidden_dim)
    wo, bo = linear(k4, hidden_dim, output_dim)

    raw = dict(ws=ws, bs=bs, wn=wn, bn=bn, wh=wh, bh=bh, wo=wo, bo=bo)

    # Fuse layer-1, pad output layer to lane-dense width, pack operands.
    w1 = jnp.concatenate([ws, wn], axis=0)                          # (s+n, hidden) f32
    b1 = bs + bn                                                    # (1, hidden)
    wo_p = jnp.zeros((hidden_dim, OUT_PAD), jnp.float32).at[:, :output_dim].set(wo)
    bo_p = jnp.zeros((1, OUT_PAD), jnp.float32).at[:, :output_dim].set(bo)

    b_packed = jnp.concatenate([b1, bh, bo_p], axis=0)              # (3, 128) f32
    w2_packed = jnp.stack([wh, wo_p], axis=0).astype(jnp.bfloat16)  # (2, 128, 128)

    fused = dict(w1=w1, b=b_packed, w2=w2_packed)
    return raw, fused


def reference_forward(state, noise, p):
    """Pure-JAX f32 reference mirroring the PyTorch module exactly."""
    x = jnp.tanh((state @ p["ws"] + p["bs"]) + (noise @ p["wn"] + p["bn"]))
    x = jnp.tanh(x @ p["wh"] + p["bh"])
    return jnp.tanh(x @ p["wo"] + p["bo"])


if __name__ == "__main__":
    # Small shapes consistent with the module:
    #   state_dim=8, action_dim(=noise_dim=output_dim)=2, hidden_dim=128, batch=8
    B, STATE_DIM, ACTION_DIM = 8, 8, 2

    key = jax.random.PRNGKey(0)
    k_params, k_state, k_noise = jax.random.split(key, 3)

    raw_params, fused_params = init_params(
        k_params, STATE_DIM, ACTION_DIM, HIDDEN_DIM, ACTION_DIM)
    state = jax.random.normal(k_state, (B, STATE_DIM), jnp.float32)
    noise = jax.random.normal(k_noise, (B, ACTION_DIM), jnp.float32)

    out = sampler_forward(state, noise, fused_params, ACTION_DIM)
    out = jax.block_until_ready(out)

    ref = reference_forward(state, noise, raw_params)
    assert out.shape == (B, ACTION_DIM)
    # bf16 MXU operands / bf16 output slab vs full-f32 reference: loosened atol.
    assert jnp.allclose(out, ref, atol=2e-2, rtol=0.0), (
        f"max abs err {jnp.max(jnp.abs(out - ref))}")

    print("KERNEL_OK")
</pallas_src>

<mosaic_0001>
module attributes {stable_mosaic.version = 11 : i64} {
  func.func @sampler_kernel(%arg0: i32, %arg1: memref<8x10xf32, #tpu.memory_space<vmem>>, %arg2: memref<10x128xf32, #tpu.memory_space<vmem>>, %arg3: memref<3x128xf32, #tpu.memory_space<vmem>>, %arg4: memref<2x128x128xbf16, #tpu.memory_space<vmem>>, %arg5: memref<8x128xbf16, #tpu.memory_space<vmem>>) attributes {dimension_semantics = [#tpu.dimension_semantics<parallel>], iteration_bounds = array<i64: 1>, scalar_prefetch = 0 : i64, scratch_operands = 0 : i64, tpu.core_type = #tpu.core_type<tc>, window_params = [{transform_indices = @transform_0, window_bounds = array<i64: 8, 10>}, {pipeline_mode = #tpu.pipeline_mode<synchronous>, transform_indices = @transform_1, window_bounds = array<i64: 10, 128>}, {pipeline_mode = #tpu.pipeline_mode<synchronous>, transform_indices = @transform_2, window_bounds = array<i64: 3, 128>}, {pipeline_mode = #tpu.pipeline_mode<synchronous>, transform_indices = @transform_3, window_bounds = array<i64: 2, 128, 128>}, {transform_indices = @transform_4, window_bounds = array<i64: 8, 128>}]} {
    %c0 = arith.constant 0 : index
    %c0_0 = arith.constant 0 : index
    %0 = vector.load %arg1[%c0, %c0_0] : memref<8x10xf32, #tpu.memory_space<vmem>>, vector<8x10xf32>
    %c0_1 = arith.constant 0 : index
    %c0_2 = arith.constant 0 : index
    %1 = vector.load %arg2[%c0_1, %c0_2] : memref<10x128xf32, #tpu.memory_space<vmem>>, vector<10x128xf32>
    %cst = arith.constant dense<0.000000e+00> : vector<8x128xf32>
    %2 = tpu.matmul %0, %1, %cst {dimension_numbers = #tpu.dot_dimension_numbers<[1], [0], [0], [1], [0, 0, 1, 1], [], []>} : vector<8x10xf32>, vector<10x128xf32>, vector<8x128xf32> -> vector<8x128xf32>
    %c0_3 = arith.constant 0 : index
    %c0_4 = arith.constant 0 : index
    %3 = vector.load %arg3[%c0_3, %c0_4] : memref<3x128xf32, #tpu.memory_space<vmem>>, vector<1x128xf32>
    %4 = vector.broadcast %3 : vector<1x128xf32> to vector<8x128xf32>
    %5 = arith.addf %2, %4 : vector<8x128xf32>
    %6 = arith.truncf %5 : vector<8x128xf32> to vector<8x128xbf16>
    %7 = math.tanh %6 : vector<8x128xbf16>
    %c0_5 = arith.constant 0 : index
    %c0_6 = arith.constant 0 : index
    %c0_7 = arith.constant 0 : index
    %8 = vector.load %arg4[%c0_5, %c0_6, %c0_7] : memref<2x128x128xbf16, #tpu.memory_space<vmem>>, vector<1x128x128xbf16>
    %9 = vector.shape_cast %8 : vector<1x128x128xbf16> to vector<128x128xbf16>
    %cst_8 = arith.constant dense<0.000000e+00> : vector<8x128xf32>
    %10 = tpu.matmul %7, %9, %cst_8 {dimension_numbers = #tpu.dot_dimension_numbers<[1], [0], [0], [1], [0, 0, 1, 1], [], []>} : vector<8x128xbf16>, vector<128x128xbf16>, vector<8x128xf32> -> vector<8x128xf32>
    %c1 = arith.constant 1 : index
    %c0_9 = arith.constant 0 : index
    %11 = vector.load %arg3[%c1, %c0_9] : memref<3x128xf32, #tpu.memory_space<vmem>>, vector<1x128xf32>
    %12 = vector.broadcast %11 : vector<1x128xf32> to vector<8x128xf32>
    %13 = arith.addf %10, %12 : vector<8x128xf32>
    %14 = arith.truncf %13 : vector<8x128xf32> to vector<8x128xbf16>
    %15 = math.tanh %14 : vector<8x128xbf16>
    %c1_10 = arith.constant 1 : index
    %c0_11 = arith.constant 0 : index
    %c0_12 = arith.constant 0 : index
    %16 = vector.load %arg4[%c1_10, %c0_11, %c0_12] : memref<2x128x128xbf16, #tpu.memory_space<vmem>>, vector<1x128x128xbf16>
    %17 = vector.shape_cast %16 : vector<1x128x128xbf16> to vector<128x128xbf16>
    %cst_13 = arith.constant dense<0.000000e+00> : vector<8x128xf32>
    %18 = tpu.matmul %15, %17, %cst_13 {dimension_numbers = #tpu.dot_dimension_numbers<[1], [0], [0], [1], [0, 0, 1, 1], [], []>} : vector<8x128xbf16>, vector<128x128xbf16>, vector<8x128xf32> -> vector<8x128xf32>
    %c2 = arith.constant 2 : index
    %c0_14 = arith.constant 0 : index
    %19 = vector.load %arg3[%c2, %c0_14] : memref<3x128xf32, #tpu.memory_space<vmem>>, vector<1x128xf32>
    %20 = vector.broadcast %19 : vector<1x128xf32> to vector<8x128xf32>
    %21 = arith.addf %18, %20 : vector<8x128xf32>
    %22 = math.tanh %21 : vector<8x128xf32>
    %23 = arith.truncf %22 : vector<8x128xf32> to vector<8x128xbf16>
    %c0_15 = arith.constant 0 : index
    %c0_16 = arith.constant 0 : index
    %24 = vector.load %arg5[%c0_15, %c0_16] : memref<8x128xbf16, #tpu.memory_space<vmem>>, vector<8x128xbf16>
    tpu.vector_store %arg5[%c0_15, %c0_16], %23 {strides = array<i32>} : memref<8x128xbf16, #tpu.memory_space<vmem>>, vector<8x128xbf16>,
    return
  }
  func.func @transform_0(%arg0: i32) -> (i32, i32) {
    %c0_i32 = arith.constant 0 : i32
    %c0_i32_0 = arith.constant 0 : i32
    return %arg0, %c0_i32 : i32, i32
  }
  func.func @transform_1(%arg0: i32) -> (i32, i32) {
    %c0_i32 = arith.constant 0 : i32
    %c0_i32_0 = arith.constant 0 : i32
    %c0_i32_1 = arith.constant 0 : i32
    return %c0_i32, %c0_i32_0 : i32, i32
  }
  func.func @transform_2(%arg0: i32) -> (i32, i32) {
    %c0_i32 = arith.constant 0 : i32
    %c0_i32_0 = arith.constant 0 : i32
    %c0_i32_1 = arith.constant 0 : i32
    return %c0_i32, %c0_i32_0 : i32, i32
  }
  func.func @transform_3(%arg0: i32) -> (i32, i32, i32) {
    %c0_i32 = arith.constant 0 : i32
    %c0_i32_0 = arith.constant 0 : i32
    %c0_i32_1 = arith.constant 0 : i32
    %c0_i32_2 = arith.constant 0 : i32
    return %c0_i32, %c0_i32_0, %c0_i32_1 : i32, i32, i32
  }
  func.func @transform_4(%arg0: i32) -> (i32, i32) {
    %c0_i32 = arith.constant 0 : i32
    %c0_i32_0 = arith.constant 0 : i32
    return %arg0, %c0_i32 : i32, i32
  }
}

</mosaic_0001>

<bundles_post_ra>
// kernel: sampler_forward.1
= control target key start
LH: loop header
LB: loop body
LE: loop exit
PB: predicated region body
PF: predicated region fallthrough
CT: control target
= control target key end

     0   :  { %9 = vsyncpa [#allocation3], 0  ;;  %s361_s18 = smov [#allocation2]   ;;  %s362_s20 = smov 64   ;;  %s413_s0 = inlined_call_operand.vmem [shape: f32[8,10], index: 0, kind: input, shape index: {}]   ;;  %s414_s1 = inlined_call_operand.vmem [shape: f32[10,128], index: 1, kind: input, shape index: {}]   ;;  %s415_s2 = inlined_call_operand.vmem [shape: f32[3,128], index: 2, kind: input, shape index: {}]   ;;  %s416_s3 = inlined_call_operand.hbm [shape: bf16[2,128,128], index: 3, kind: input, shape index: {}]   ;;  %s417_s4 = inlined_call_operand.vmem [shape: bf16[8,128], index: 4, kind: output, shape index: {}]  }
   0x1   :  { %s20_s17 = sshll.u32 %s416_s3, 4  ;;  %s22_s19 = sshll.u32 %s361_s18, 4  ;;  %s21_s17 = int_to_ptr.hbm [resolvable:$true] %s20_s17  ;;  %s23_s19 = int_to_ptr.vmem [resolvable:$true] %s22_s19 }
   0x2   :  { %s363_s21 = smov 4  }
   0x3   :  { %28 = dma.hbm_to_vmem [thread:$0]  %s21_s17, 2048, %s23_s19, [#allocation3], %s362_s20, %s362_s20, %s363_s21  }
   0x4   :  { %359 = dma.done.wait [#allocation3], 2048  }
   0x5   :  { %360 = vsyncadd [#allocation3], 4294965248  ;;  %vm42_vm0 = vcmask 1041408   ;;  %v35_v0 = vld [vmem:[%s414_s1 + $0x8] sm:$0x3]  ;;  %v34_v1 = vld [vmem:[%s414_s1] sm:$0xff] }
   0x6   :  { %241 = vmatpush.msk.msra.mxu0 %vm42_vm0, %v35_v0  ;;  %v33_v2 = vld [vmem:[%s413_s0] sm:$0xff]  ;;  %vm38_vm1 = vcmask 80896   ;;  %v314_v3 = vld [vmem:[#allocation2 + $0x38] sm:$0xff]  ;;  %v313_v4 = vld [vmem:[#allocation2 + $0x30] sm:$0xff] }
   0x7   :  { %136 = vmatpush.bf16.msra.mxu1 %v314_v3  ;;  %v312_v5 = vld [vmem:[#allocation2 + $0x28] sm:$0xff]  ;;  %v311_v6 = vld [vmem:[#allocation2 + $0x20] sm:$0xff]  ;;  %v310_v7 = vld [vmem:[#allocation2 + $0x18] sm:$0xff] }
   0x8   :  { %61 = vmatpush.msra.mxu0 %v34_v1  ;;  %v309_v8 = vld [vmem:[#allocation2 + $0x10] sm:$0xff]  ;;  %v308_v9 = vld [vmem:[#allocation2 + $0x8] sm:$0xff]  ;;  %v307_v10 = vld [vmem:[#allocation2] sm:$0xff] }
   0x9   :  { %242 = vmatmul.msk.f32.vlgmr.msra.gmra.mxu0 %vm38_vm1, %v33_v2  ;;  %v322_v11 = vld [vmem:[#allocation2 + $0x78] sm:$0xff]  ;;  %v321_v12 = vld [vmem:[#allocation2 + $0x70] sm:$0xff]  ;;  %v320_v13 = vld [vmem:[#allocation2 + $0x68] sm:$0xff] }
   0xa   :  { %220 = vmatpush.bf16.msra.mxu2 %v322_v11  ;;  %v319_v14 = vld [vmem:[#allocation2 + $0x60] sm:$0xff]  ;;  %v318_v22 = vld [vmem:[#allocation2 + $0x58] sm:$0xff]  ;;  %v317_v23 = vld [vmem:[#allocation2 + $0x50] sm:$0xff] }
   0xb   :  { %137 = vmatpush.bf16.msra.mxu1 %v313_v4  ;;  %v326_v15 = vld [vmem:[%s415_s2] ss:$0 sm:$0xff]  ;;  %v316_v24 = vld [vmem:[#allocation2 + $0x48] sm:$0xff]  ;;  %v327_v26 = vld [vmem:[%s415_s2 + $0x1] ss:$0 sm:$0xff] }
   0xc   :  { %v315_v25 = vld [vmem:[#allocation2 + $0x40] sm:$0xff] }
   0xd   :  { %v328_v34 = vld [vmem:[%s415_s2 + $0x2] ss:$0 sm:$0xff] }
   0xe   :  { %221 = vmatpush.bf16.msra.mxu2 %v321_v12 }
   0xf   :  { %138 = vmatpush.bf16.msra.mxu1 %v312_v5 }
  0x12   :  { %222 = vmatpush.bf16.msra.mxu2 %v320_v13 }
  0x13   :  { %139 = vmatpush.bf16.msra.mxu1 %v311_v6 }
  0x16   :  { %223 = vmatpush.bf16.msra.mxu2 %v319_v14 }
  0x17   :  { %140 = vmatpush.bf16.msra.mxu1 %v310_v7 }
  0x1a   :  { %224 = vmatpush.bf16.msra.mxu2 %v318_v22 }
  0x1b   :  { %141 = vmatpush.bf16.msra.mxu1 %v309_v8 }
  0x1e   :  { %225 = vmatpush.bf16.msra.mxu2 %v317_v23 }
  0x1f   :  { %142 = vmatpush.bf16.msra.mxu1 %v308_v9 }
  0x22   :  { %226 = vmatpush.bf16.msra.mxu2 %v316_v24 }
  0x23   :  { %143 = vmatpush.bf16.msra.mxu1 %v307_v10 }
  0x26   :  { %227 = vmatpush.bf16.msra.mxu2 %v315_v25 }
  0x86   :  { %v63_v16 = vpop.f32.mrf.mxu0 }
  0x87   :  { %v64_v17 = vadd.f32 %v326_v15, %v63_v16 }
  0x89   :  { %v66_v18 = vpack.c.bf16 %v64_v17, %v64_v17 }
  0x8b   :  { %v67_v19 = vunpack.c.l.bf16 %v66_v18 }
  0x8d   :  { %329 = vtanh.f32 %v67_v19 }
  0x93   :  { %v330_v20 = vpop.eup %329 }
  0x94   :  { %v69_v21 = vpack.c.bf16 %v330_v20, %v330_v20 }
  0x96   :  { %144 = vmatmul.bf16.vlgmr.msra.gmra.mxu1 %v69_v21 }
 0x113   :  { %v145_v27 = vpop.f32.mrf.mxu1 }
 0x114   :  { %v146_v28 = vadd.f32 %v327_v26, %v145_v27 }
 0x116   :  { %v149_v29 = vpack.c.bf16 %v146_v28, %v146_v28 }
 0x118   :  { %v150_v30 = vunpack.c.l.bf16 %v149_v29 }
 0x11a   :  { %331 = vtanh.f32 %v150_v30 }
 0x11b   :  { %v147_v31 = vpop.f32.mrf.mxu1 }
 0x120   :  { %v332_v32 = vpop.eup %331 }
 0x121   :  { %v152_v33 = vpack.c.bf16 %v332_v32, %v332_v32 }
 0x123   :  { %228 = vmatmul.bf16.vlgmr.msra.gmra.mxu2 %v152_v33 }
 0x1a6   :  { %v229_v35 = vpop.f32.mrf.mxu2 }
 0x1a7   :  { %v230_v36 = vadd.f32 %v328_v34, %v229_v35 }
 0x1a9   :  { %333 = vtanh.f32 %v230_v36 }
 0x1ae   :  { %v231_v37 = vpop.f32.mrf.mxu2 }
 0x1af   :  { %v334_v38 = vpop.eup %333 }
 0x1b0   :  { %v234_v39 = vpack.c.bf16 %v334_v38, %v334_v38 }
 0x1b2   :  { %235 = vst [vmem:[%s417_s4] sm:$0xf] %v234_v39 }
 0x1b3   :  { %240 = vsyncpa [#allocation3], 1 }

</bundles_post_ra>
